<compile_context>
chip_gen: v5e
topology: v5e:2x2
jax: 0.10.0
libtpu: 0.0.40
codegen_flags: <defaults>
</compile_context>

<pallas_src>
import jax
import jax.numpy as jnp
from jax.experimental import pallas as pl
from jax.experimental.pallas import tpu as pltpu


def _smooth_band(n):
    """(n, n) banded matrix for the [1, 2, 1] smoothing tap (zero padded)."""
    d = jnp.arange(n)[None, :] - jnp.arange(n)[:, None]
    return ((d == 0) * 2.0 + (jnp.abs(d) == 1) * 1.0).astype(jnp.float32)


def _diff_band(n):
    """(n, n) banded matrix for the central difference [+1, 0, -1] tap.

    As a right operand:  (S @ D)[i, j] = S[i, j+1] - S[i, j-1];
    as a left operand:   (D @ T)[i, j] = T[i-1, j] - T[i+1, j];
    out-of-range rows/cols contribute zero, i.e. conv2d padding=1 semantics.
    """
    d = jnp.arange(n)[None, :] - jnp.arange(n)[:, None]
    return ((d == -1) * 1.0 - (d == 1) * 1.0).astype(jnp.float32)


def _sobelxy_kernel(x_ref, sm_h_ref, df_h_ref, sm_w_ref, df_w_ref, o_ref):
    """x_ref/o_ref: (TB, H, W) packed planes; operator refs: (H,H) / (W,W)."""
    sm_h = sm_h_ref[...]
    df_h = df_h_ref[...]
    sm_w = sm_w_ref[...]
    df_w = df_w_ref[...]
    for t in range(x_ref.shape[0]):           # static unroll over packed planes
        x = x_ref[t].astype(jnp.float32)      # (H, W)
        s = jnp.dot(sm_h, x, preferred_element_type=jnp.float32)    # [1,2,1] over rows
        gx = jnp.dot(s, df_w, preferred_element_type=jnp.float32)   # d/dx
        q = jnp.dot(x, sm_w, preferred_element_type=jnp.float32)    # [1,2,1] over cols
        gy = jnp.dot(df_h, q, preferred_element_type=jnp.float32)   # d/dy
        o_ref[t] = (jnp.abs(gx) + jnp.abs(gy)).astype(o_ref.dtype)


def _pick_batch_tile(batch, plane_bytes):
    """Planes per grid step: big enough to amortize per-step overhead, small
    enough for comfortable double-buffering under default VMEM limits, and
    leaving >= 2 grid steps (when batch > 1) so both v7x TensorCores get work."""
    target_bytes = 512 * 1024
    cap_bytes = 2 * 1024 * 1024
    best = 1
    for tb in range(1, min(batch, 16) + 1):
        if batch % tb:
            continue
        if tb * plane_bytes > cap_bytes:
            break
        if batch > 1 and batch // tb < 2:
            break
        best = tb
        if tb * plane_bytes >= target_bytes:
            break
    return best


def sobelxy(x):
    """x: (N, 1, H, W) -> (N, 1, H, W), matching Sobelxy.forward (dtype preserved)."""
    n, c, h, w = x.shape
    assert c == 1, "Sobelxy's conv weights have in_channels == out_channels == 1"
    b = n * c
    x3 = x.reshape(b, h, w)

    sm_h, df_h = _smooth_band(h), _diff_band(h)
    sm_w, df_w = _smooth_band(w), _diff_band(w)

    tb = _pick_batch_tile(b, h * w * x.dtype.itemsize)
    grid = (b // tb,)

    flops = 4 * b * h * w * (h + w)   # two (H,H)@(H,W) + two (H,W)@(W,W) per plane
    bytes_accessed = 2 * b * h * w * x.dtype.itemsize + 8 * (h * h + w * w)

    out = pl.pallas_call(
        _sobelxy_kernel,
        out_shape=jax.ShapeDtypeStruct((b, h, w), x.dtype),
        grid_spec=pl.GridSpec(
            grid=grid,
            in_specs=[
                pl.BlockSpec((tb, h, w), lambda i: (i, 0, 0)),
                pl.BlockSpec((h, h), lambda i: (0, 0)),  # operators: constant block
                pl.BlockSpec((h, h), lambda i: (0, 0)),  # index -> fetched once
                pl.BlockSpec((w, w), lambda i: (0, 0)),
                pl.BlockSpec((w, w), lambda i: (0, 0)),
            ],
            out_specs=pl.BlockSpec((tb, h, w), lambda i: (i, 0, 0)),
        ),
        compiler_params=pltpu.CompilerParams(
            dimension_semantics=("parallel",)),
        cost_estimate=pl.CostEstimate(
            flops=flops, transcendentals=0, bytes_accessed=bytes_accessed),
    )(x3, sm_h, df_h, sm_w, df_w)

    return out.reshape(n, c, h, w)


def _sobelxy_ref(x):
    """Pure-JAX reference (lax.conv), used only for the correctness check."""
    kx = jnp.asarray([[-1.0, 0.0, 1.0], [-2.0, 0.0, 2.0], [-1.0, 0.0, 1.0]],
                     jnp.float32).reshape(1, 1, 3, 3)
    ky = jnp.asarray([[1.0, 2.0, 1.0], [0.0, 0.0, 0.0], [-1.0, -2.0, -1.0]],
                     jnp.float32).reshape(1, 1, 3, 3)
    xf = x.astype(jnp.float32)
    dn = jax.lax.conv_dimension_numbers(xf.shape, kx.shape, ("NCHW", "OIHW", "NCHW"))
    sx = jax.lax.conv_general_dilated(xf, kx, (1, 1), ((1, 1), (1, 1)),
                                      dimension_numbers=dn)
    sy = jax.lax.conv_general_dilated(xf, ky, (1, 1), ((1, 1), (1, 1)),
                                      dimension_numbers=dn)
    return (jnp.abs(sx) + jnp.abs(sy)).astype(x.dtype)


if __name__ == "__main__":
    key = jax.random.PRNGKey(0)
    k1, k2 = jax.random.split(key)

    # Integer-valued pixels keep every intermediate exactly representable, so
    # the check is independent of the MXU's f32 pass count.
    x1 = jax.random.randint(k1, (2, 1, 16, 16), -8, 8).astype(jnp.float32)
    x2 = jax.random.randint(k2, (4, 1, 8, 24), -8, 8).astype(jnp.float32)

    for x in (x1, x2):
        out = jax.block_until_ready(sobelxy(x))
        ref = jax.block_until_ready(_sobelxy_ref(x))
        assert out.shape == x.shape and out.dtype == x.dtype
        assert jnp.allclose(out, ref, atol=1e-5, rtol=1e-5)
    print("KERNEL_OK")
</pallas_src>

<mosaic_0001>
module attributes {stable_mosaic.version = 11 : i64} {
  func.func @_sobelxy_kernel(%arg0: i32, %arg1: memref<1x16x16xf32, #tpu.memory_space<vmem>>, %arg2: memref<16x16xf32, #tpu.memory_space<vmem>>, %arg3: memref<16x16xf32, #tpu.memory_space<vmem>>, %arg4: memref<16x16xf32, #tpu.memory_space<vmem>>, %arg5: memref<16x16xf32, #tpu.memory_space<vmem>>, %arg6: memref<1x16x16xf32, #tpu.memory_space<vmem>>) attributes {dimension_semantics = [#tpu.dimension_semantics<parallel>], iteration_bounds = array<i64: 2>, scalar_prefetch = 0 : i64, scratch_operands = 0 : i64, tpu.core_type = #tpu.core_type<tc>, window_params = [{transform_indices = @transform_0, window_bounds = array<i64: 1, 16, 16>}, {pipeline_mode = #tpu.pipeline_mode<synchronous>, transform_indices = @transform_1, window_bounds = array<i64: 16, 16>}, {pipeline_mode = #tpu.pipeline_mode<synchronous>, transform_indices = @transform_2, window_bounds = array<i64: 16, 16>}, {pipeline_mode = #tpu.pipeline_mode<synchronous>, transform_indices = @transform_3, window_bounds = array<i64: 16, 16>}, {pipeline_mode = #tpu.pipeline_mode<synchronous>, transform_indices = @transform_4, window_bounds = array<i64: 16, 16>}, {transform_indices = @transform_5, window_bounds = array<i64: 1, 16, 16>}]} {
    %c0 = arith.constant 0 : index
    %c0_0 = arith.constant 0 : index
    %0 = vector.load %arg2[%c0, %c0_0] : memref<16x16xf32, #tpu.memory_space<vmem>>, vector<16x16xf32>
    %c0_1 = arith.constant 0 : index
    %c0_2 = arith.constant 0 : index
    %1 = vector.load %arg3[%c0_1, %c0_2] : memref<16x16xf32, #tpu.memory_space<vmem>>, vector<16x16xf32>
    %c0_3 = arith.constant 0 : index
    %c0_4 = arith.constant 0 : index
    %2 = vector.load %arg4[%c0_3, %c0_4] : memref<16x16xf32, #tpu.memory_space<vmem>>, vector<16x16xf32>
    %c0_5 = arith.constant 0 : index
    %c0_6 = arith.constant 0 : index
    %3 = vector.load %arg5[%c0_5, %c0_6] : memref<16x16xf32, #tpu.memory_space<vmem>>, vector<16x16xf32>
    %c0_7 = arith.constant 0 : index
    %c0_8 = arith.constant 0 : index
    %c0_9 = arith.constant 0 : index
    %4 = vector.load %arg1[%c0_7, %c0_8, %c0_9] : memref<1x16x16xf32, #tpu.memory_space<vmem>>, vector<1x16x16xf32>
    %5 = vector.shape_cast %4 : vector<1x16x16xf32> to vector<16x16xf32>
    %cst = arith.constant dense<0.000000e+00> : vector<16x16xf32>
    %6 = tpu.matmul %0, %5, %cst {dimension_numbers = #tpu.dot_dimension_numbers<[1], [0], [0], [1], [0, 0, 1, 1], [], []>} : vector<16x16xf32>, vector<16x16xf32>, vector<16x16xf32> -> vector<16x16xf32>
    %cst_10 = arith.constant dense<0.000000e+00> : vector<16x16xf32>
    %7 = tpu.matmul %6, %3, %cst_10 {dimension_numbers = #tpu.dot_dimension_numbers<[1], [0], [0], [1], [0, 0, 1, 1], [], []>} : vector<16x16xf32>, vector<16x16xf32>, vector<16x16xf32> -> vector<16x16xf32>
    %cst_11 = arith.constant dense<0.000000e+00> : vector<16x16xf32>
    %8 = tpu.matmul %5, %2, %cst_11 {dimension_numbers = #tpu.dot_dimension_numbers<[1], [0], [0], [1], [0, 0, 1, 1], [], []>} : vector<16x16xf32>, vector<16x16xf32>, vector<16x16xf32> -> vector<16x16xf32>
    %cst_12 = arith.constant dense<0.000000e+00> : vector<16x16xf32>
    %9 = tpu.matmul %1, %8, %cst_12 {dimension_numbers = #tpu.dot_dimension_numbers<[1], [0], [0], [1], [0, 0, 1, 1], [], []>} : vector<16x16xf32>, vector<16x16xf32>, vector<16x16xf32> -> vector<16x16xf32>
    %10 = math.absf %7 : vector<16x16xf32>
    %11 = math.absf %9 : vector<16x16xf32>
    %12 = arith.addf %10, %11 : vector<16x16xf32>
    %c0_13 = arith.constant 0 : index
    %c0_14 = arith.constant 0 : index
    %c0_15 = arith.constant 0 : index
    %13 = vector.load %arg6[%c0_13, %c0_14, %c0_15] : memref<1x16x16xf32, #tpu.memory_space<vmem>>, vector<1x16x16xf32>
    %14 = vector.shape_cast %13 : vector<1x16x16xf32> to vector<16x16xf32>
    %15 = vector.shape_cast %12 : vector<16x16xf32> to vector<1x16x16xf32>
    tpu.vector_store %arg6[%c0_13, %c0_14, %c0_15], %15 {strides = array<i32>} : memref<1x16x16xf32, #tpu.memory_space<vmem>>, vector<1x16x16xf32>,
    return
  }
  func.func @transform_0(%arg0: i32) -> (i32, i32, i32) {
    %c0_i32 = arith.constant 0 : i32
    %c0_i32_0 = arith.constant 0 : i32
    %c0_i32_1 = arith.constant 0 : i32
    return %arg0, %c0_i32, %c0_i32_0 : i32, i32, i32
  }
  func.func @transform_1(%arg0: i32) -> (i32, i32) {
    %c0_i32 = arith.constant 0 : i32
    %c0_i32_0 = arith.constant 0 : i32
    %c0_i32_1 = arith.constant 0 : i32
    return %c0_i32, %c0_i32_0 : i32, i32
  }
  func.func @transform_2(%arg0: i32) -> (i32, i32) {
    %c0_i32 = arith.constant 0 : i32
    %c0_i32_0 = arith.constant 0 : i32
    %c0_i32_1 = arith.constant 0 : i32
    return %c0_i32, %c0_i32_0 : i32, i32
  }
  func.func @transform_3(%arg0: i32) -> (i32, i32) {
    %c0_i32 = arith.constant 0 : i32
    %c0_i32_0 = arith.constant 0 : i32
    %c0_i32_1 = arith.constant 0 : i32
    return %c0_i32, %c0_i32_0 : i32, i32
  }
  func.func @transform_4(%arg0: i32) -> (i32, i32) {
    %c0_i32 = arith.constant 0 : i32
    %c0_i32_0 = arith.constant 0 : i32
    %c0_i32_1 = arith.constant 0 : i32
    return %c0_i32, %c0_i32_0 : i32, i32
  }
  func.func @transform_5(%arg0: i32) -> (i32, i32, i32) {
    %c0_i32 = arith.constant 0 : i32
    %c0_i32_0 = arith.constant 0 : i32
    %c0_i32_1 = arith.constant 0 : i32
    return %arg0, %c0_i32, %c0_i32_0 : i32, i32, i32
  }
}

</mosaic_0001>

<bundles_post_ra>
// kernel: tpu_custom_call.1
= control target key start
LH: loop header
LB: loop body
LE: loop exit
PB: predicated region body
PF: predicated region fallthrough
CT: control target
= control target key end

     0   :  { %10 = vsyncpa [#allocation3], 0  ;;  %s1152_s0 = inlined_call_operand.hbm [shape: f32[2,16,16], index: 0, kind: input, shape index: {}]   ;;  %s1153_s1 = inlined_call_operand.hbm [shape: f32[16,16], index: 1, kind: input, shape index: {}]   ;;  %s1154_s2 = inlined_call_operand.hbm [shape: f32[16,16], index: 2, kind: input, shape index: {}]   ;;  %s1155_s3 = inlined_call_operand.hbm [shape: f32[16,16], index: 3, kind: input, shape index: {}]   ;;  %s1156_s4 = inlined_call_operand.hbm [shape: f32[16,16], index: 4, kind: input, shape index: {}]   ;;  %s1157_s5 = inlined_call_operand.hbm [shape: f32[2,16,16], index: 5, kind: output, shape index: {}]  }
   0x1   :  { %12 = vsyncpa [#allocation3 + $0x1], 0 }
   0x2   :  { %13 = vsyncpa [#allocation6], 0 }
   0x3   :  { %14 = vsyncpa [#allocation9], 0 }
   0x4   :  { %15 = vsyncpa [#allocation4], 0 }
   0x5   :  { %17 = vsyncpa [#allocation4 + $0x1], 0  ;;  %s960_s18 = smov 0   ;;  %s962_s19 = smov 0  }
   0x6   :  { %s964_s20 = smov 0   ;;  %s966_s21 = smov 0  }
   0x7 LB: > { %s981_s22 = sadd.s32 4294967295, %s920_s21   ;;  %s573_s23 = sadd.s32 4294967294, %s920_s21   ;;  %s920_s21 = sphi %s966_s21, %s1170_s21   ;;  %s916_s20 = sphi %s964_s20, %s1169_s20   ;;  %s912_s19 = sphi %s962_s19, %s1168_s19   ;;  %s908_s18 = sphi %s960_s18, %s1167_s18  }
   0x8   : > { %p43_p0 = scmp.ne.s32.totalorder %s912_s19, %s908_s18  ;;  %p44_p1 = scmp.eq.s32.totalorder %s981_s22, 0 }
   0x9   : > { %p151_p2 = scmp.eq.s32.totalorder %s981_s22, 1  ;;  %p157_p3 = scmp.eq.s32.totalorder %s573_s23, 1 }
   0xa   : > { %p990_p4 = por %p44_p1, %p43_p0  ;;  %p574_p5 = scmp.ge.s32.totalorder %s920_s21, 1 }
   0xb   : > { %p995_p6 = por %p157_p3, %p43_p0  ;;  %p164_p7 = scmp.lt.s32.totalorder %s920_s21, 3 }
   0xc   : > { %s175_s28 = sshll.u32 %s1153_s1, 4  ;;  %s922_s30 = smov [#allocation5]   ;;  %s176_s28 = int_to_ptr.hbm [resolvable:$true] %s175_s28 }
   0xd   : > { %p1003_p8 = pnand %p574_p5, %p164_p7  ;;  %s177_s6 = sshll.u32 %s922_s30, 4  ;;  %s178_s6 = int_to_ptr.vmem [resolvable:$true] %s177_s6 }
   0xe   : > { %s203_s10 = sshll.u32 %s1155_s3, 4  ;;  %s1158_s11 = smov 128   ;;  %s204_s10 = int_to_ptr.hbm [resolvable:$true] %s203_s10 }
   0xf   : > { %p625_p9 = pneg %p1003_p8  ;;  %s924_s12 = smov 8  }
  0x10   : > { %s925_s13 = smov [#allocation8]   ;;  %s189_s17 = sshll.u32 %s1154_s2, 4  ;;  %s190_s17 = int_to_ptr.hbm [resolvable:$true] %s189_s17 }
  0x11   : > { %p1011_p10 = pnand %p625_p9, %p44_p1  ;;  %s205_s14 = sshll.u32 %s925_s13, 4  ;;  %s206_s14 = int_to_ptr.vmem [resolvable:$true] %s205_s14 }
  0x12   : > { %s217_s27 = sshll.u32 %s1156_s4, 4  ;;  %s1046_s9 = sadd.s32 1, %s920_s21   ;;  %s218_s27 = int_to_ptr.hbm [resolvable:$true] %s217_s27 }
  0x13   : > { %628 = dma.hbm_to_vmem [thread:$0]  (!%p1011_p10), %s176_s28, 256, %s178_s6, [#allocation6], %s1158_s11, %s1158_s11, %s924_s12  }
  0x14   : > { %634 = dma.hbm_to_vmem [thread:$0]  (!%p1011_p10), %s204_s10, 256, %s206_s14, [#allocation9], %s1158_s11, %s1158_s11, %s924_s12  }
  0x15   : > { %s926_s28 = smov [#allocation7]   ;;  %s927_s6 = smov [#allocation10]  }
  0x16   : > { %s191_s30 = sshll.u32 %s926_s28, 4  ;;  %s219_s8 = sshll.u32 %s927_s6, 4  ;;  %s192_s30 = int_to_ptr.vmem [resolvable:$true] %s191_s30  ;;  %s220_s8 = int_to_ptr.vmem [resolvable:$true] %s219_s8 }
  0x17   : > { %631 = dma.hbm_to_vmem [thread:$0]  (!%p1011_p10), %s190_s17, 256, %s192_s30, [#allocation6], %s1158_s11, %s1158_s11, %s924_s12  }
  0x18   : > { %637 = dma.hbm_to_vmem [thread:$0]  (!%p1011_p10), %s218_s27, 256, %s220_s8, [#allocation9], %s1158_s11, %s1158_s11, %s924_s12  }
  0x19   : > { %s30_s10 = sadd.s32 1, %s916_s20  ;;  %s27_s13 = ssub.s32 %s920_s21, %s1046_s9 }
  0x1a   : > { %p37_p12 = scmp.ne.s32.totalorder %s916_s20, %s912_s19  ;;  %p28_p13 = scmp.eq.s32.totalorder %s27_s13, 0 }
  0x1b   : > { %p38_p0 = scmp.eq.s32.totalorder %s920_s21, 0  ;;  %p650_p5 = scmp.lt.s32.totalorder %s920_s21, 2 }
  0x1c   : > { %p1056_p3 = por %p151_p2, %p37_p12  ;;  %s233_s7 = sand.u32 1, %s916_s20  }
  0x1d   : > { %s1062_s15 = scalar_select %p28_p13, %s916_s20, %s30_s10  }
  0x1e   : > { %p39_p7 = por %p38_p0, %p37_p12  ;;  %s580_s16 = sshll.u32 %s233_s7, 4 }
  0x1f   : > { %s603_s17 = sshll.u32 %s920_s21, 4  ;;  %s237_s28 = scalar_lea.vmem [#allocation2], %s580_s16 }
  0x20   : > { %s242_s27 = scalar_lea.hbm %s1152_s0, %s603_s17  ;;  %s245_s30 = sshll.u32 %s237_s28, 4  ;;  %s246_s30 = int_to_ptr.vmem [resolvable:$true] %s245_s30 }
  0x21   : > { %s243_s6 = sshll.u32 %s242_s27, 4  ;;  %p1069_p2 = pnand %p650_p5, %p39_p7  ;;  %s244_s6 = int_to_ptr.hbm [resolvable:$true] %s243_s6 }
  0x22   : > { %s234_s10 = scalar_lea.sflag [#allocation3], %s233_s7  ;;  %s816_s13 = sshra.s32 %s244_s6, 4  ;;  %s817_s13 = int_to_ptr.hbm [resolvable:$true] %s816_s13 }
  0x23   : > { %s818_s11 = scalar_lea.hbm %s817_s13, 16  ;;  %p820_p10 = pneg %p1069_p2 }
  0x24   : > { %p819_p9 = scmp.ne.s32.totalorder %s817_s13, %s818_s11  ;;  %s823_s23 = scalar_lea.hbm %s1152_s0, 32 }
  0x25   : > { %p824_p0 = scmp.lt.s32.totalorder %s817_s13, %s1152_s0  ;;  %p825_p5 = scmp.lt.s32.totalorder %s823_s23, %s818_s11 }
  0x26   : > { %p821_p12 = pnand %p820_p10, %p819_p9 }
  0x27   : > { %p826_p7 = por %p825_p5, %p824_p0 }
  0x28   : > { %p822_p13 = pneg %p821_p12 }
  0x2a   : > { %p827_p11 = pnand %p826_p7, %p822_p13 }
  0x2c   : > { %830 = shalt.err (!%p827_p11)
}
  0x2d   : > { %s1165_s7 = smov 128   ;;  %257 = sbr.rel (%p1003_p8) target bundleno = 350 (0x15e), region = 40 }
  0x2e   : > { %641 = dma.hbm_to_vmem [thread:$0]  (!%p1069_p2), %s244_s6, 256, %s246_s30, %s234_s10, %s1165_s7, %s1165_s7, %s924_s12  }
  0x2f   : > { %s1089_s28 = sand.u32 (!%p1003_p8), 1, %s912_s19  }
  0x30   : > { %s584_s11 = sshll.u32 (!%p1003_p8), %s1089_s28, 4  ;;  %s260_s13 = scalar_lea.sflag (!%p1003_p8), [#allocation3], %s1089_s28 }
  0x31   : > { %s263_s17 = scalar_lea.vmem (!%p1003_p8), [#allocation2], %s584_s11 }
  0x32   : > { %891 = dma.done.wait (%p990_p4), %s260_s13, 256  }
  0x33   : > { %893 = vsyncadd (%p990_p4), %s260_s13, 4294967040 }
  0x34   : > { %895 = dma.done.wait (%p44_p1), [#allocation6], 512  }
  0x35   : > { %897 = vsyncadd (%p44_p1), [#allocation6], 4294966784 }
  0x36   : > { %899 = dma.done.wait (%p44_p1), [#allocation9], 512  }
  0x37   : > { %901 = vsyncadd (%p44_p1), [#allocation9], 4294966784  ;;  %v316_v0 = vld [vmem:[#allocation8 + $0x8] sm:$0xff]  ;;  %v315_v1 = vld [vmem:[#allocation8] sm:$0xff]  ;;  %vm321_vm0 = vcmask 130048   ;;  %s604_s24 = sshll.u32 %s981_s22, 4 }
  0x38   : > { %400 = vmatpush.msra.mxu2 %v316_v0  ;;  %v319_v2 = vld [vmem:[%s263_s17] sm:$0xff]  ;;  %v320_v3 = vld [vmem:[%s263_s17 + $0x8] sm:$0xff]  ;;  %s458_s30 = scalar_lea.hbm %s1157_s5, %s604_s24  ;;  %s310_s6 = scalar_lea.vmem [#allocation11], %s584_s11 }
  0x39   : > { %342 = vmatpush.msra.mxu0 %v320_v3  ;;  %v311_v4 = vld [vmem:[#allocation5] sm:$0xff]  ;;  %v312_v5 = vld [vmem:[#allocation5 + $0x8] sm:$0xff]  ;;  %v318_v6 = vld [vmem:[#allocation10 + $0x8] sm:$0xff]  ;;  %s459_s8 = sshll.u32 %s310_s6, 4  ;;  %s461_s10 = sshll.u32 %s458_s30, 4  ;;  %s460_s8 = int_to_ptr.vmem [resolvable:$true] %s459_s8  ;;  %s462_s10 = int_to_ptr.hbm [resolvable:$true] %s461_s10 }
  0x3a   : > { %401 = vmatpush.msra.mxu2 %v315_v1  ;;  %v317_v7 = vld [vmem:[#allocation10] sm:$0xff]  ;;  %371 = vmatpush.msra.mxu1 %v318_v6  ;;  %v314_v13 = vld [vmem:[#allocation7 + $0x8] sm:$0xff]  ;;  %s447_s22 = scalar_lea.sflag [#allocation4], %s1089_s28  ;;  %s860_s16 = sshra.s32 %s462_s10, 4  ;;  %s861_s16 = int_to_ptr.hbm [resolvable:$true] %s860_s16 }
  0x3b   : > { %594 = vmatmul.msk.f32.vlgmr.msra.gmra.mxu2 %vm321_vm0, %v319_v2  ;;  %343 = vmatpush.msra.mxu0 %v319_v2  ;;  %v313_v12 = vld [vmem:[#allocation7] sm:$0xff]  ;;  %s862_s23 = scalar_lea.hbm %s861_s16, 16  ;;  %s866_s7 = scalar_lea.hbm %s1157_s5, 32 }
  0x3c   : > { %590 = vmatmul.msk.f32.vlgmr.msra.gmra.mxu0 %vm321_vm0, %v311_v4  ;;  %372 = vmatpush.msra.mxu1 %v317_v7  ;;  %p863_p1 = scmp.ne.s32.totalorder %s861_s16, %s862_s23  ;;  %p867_p11 = scmp.lt.s32.totalorder %s861_s16, %s1157_s5 }
  0x3d   : > { %p868_p2 = scmp.lt.s32.totalorder %s866_s7, %s862_s23 }
  0x3e   : > { %p864_p4 = pnand %p863_p1, %p1056_p3 }
  0x3f   : > { %p869_p9 = por %p868_p2, %p867_p11 }
  0x40   : > { %p865_p8 = pneg %p864_p4 }
  0x42   : > { %p870_p10 = pnand %p869_p9, %p865_p8 }
  0x43   : > { %595 = vmatmul.msk.f32.gmra.mxu2 %vm321_vm0, %v320_v3 }
  0x44   : > { %591 = vmatmul.msk.f32.gmra.mxu0 %vm321_vm0, %v312_v5 }
  0xb9   : > { %v345_v8 = vpop.f32.mrf.mxu0 }
  0xba   : > { %592 = vmatmul.msk.f32.vlgmr.msra.gmra.mxu1 %vm321_vm0, %v345_v8 }
  0xbe   : > { %v403_v9 = vpop.f32.mrf.mxu2 }
  0xc1   : > { %v348_v10 = vpop.f32.mrf.mxu0 }
  0xc2   : > { %593 = vmatmul.msk.f32.gmra.mxu1 %vm321_vm0, %v348_v10 }
  0xc6   : > { %v406_v11 = vpop.f32.mrf.mxu2 }
  0xc7   : > { %429 = vmatpush.msra.mxu3 %v406_v11 }
  0xc9   : > { %430 = vmatpush.msra.mxu3 %v403_v9 }
  0xca   : > { %596 = vmatmul.msk.f32.vlgmr.msra.gmra.mxu3 %vm321_vm0, %v313_v12 }
  0xd2   : > { %597 = vmatmul.msk.f32.gmra.mxu3 %vm321_vm0, %v314_v13 }
 0x137   : > { %v374_v14 = vpop.f32.mrf.mxu1 }
 0x138   : > { %v438_v15 = vand.u32 2147483647, %v374_v14 }
 0x13f   : > { %v377_v19 = vpop.f32.mrf.mxu1 }
 0x140   : > { %v439_v20 = vand.u32 2147483647, %v377_v19 }
 0x14d   : > { %v432_v16 = vpop.f32.mrf.mxu3 }
 0x14e   : > { %v440_v17 = vand.u32 2147483647, %v432_v16 }
 0x150   : > { %v442_v18 = vadd.f32 %v440_v17, %v438_v15 }
 0x152   : > { %444 = vst.msk [vmem:[%s310_s6] sm:$0xff] %vm321_vm0, %v442_v18 }
 0x155   : > { %v435_v21 = vpop.f32.mrf.mxu3 }
 0x156   : > { %v441_v22 = vand.u32 2147483647, %v435_v21 }
 0x158   : > { %v443_v23 = vadd.f32 %v441_v22, %v439_v20 }
 0x15a   : > { %445 = vst.msk [vmem:[%s310_s6 + $0x8] sm:$0xff] %vm321_vm0, %v443_v23 }
 0x15b   : > { %873 = shalt.err (!%p870_p10)
}
 0x15c   : > { %s928_s28 = smov 128   ;;  %s929_s17 = smov 8  }
 0x15d   : > { %623 = dma.vmem_to_hbm [thread:$0]  (%p1056_p3), %s460_s8, 256, %s462_s10, %s447_s22, %s928_s28, %s928_s28, %s929_s17  }
 0x15e PF: > { %s476_s24 = sand.u32 1, %s908_s18   ;;  %p1166_p12 = scmp.ge.s32.totalorder %s920_s21, 2 }
 0x15f   : > { %s477_s29 = scalar_lea.sflag [#allocation4], %s476_s24 }
 0x160   : > { %p643_p13 = pnand %p1166_p12, %p995_p6 }
 0x162   : > { %p644_p0 = pneg %p643_p13 }
 0x164   : > { %903 = dma.done.wait (%p644_p0), %s477_s29, 256  }
 0x165   : > { %905 = vsyncadd (%p644_p0), %s477_s29, 4294967040  ;;  %p20_p5 = scmp.ge.s32.totalorder %s1046_s9, 4   ;;  %s1167_s18 = smov %s912_s19 }
 0x166   : > { %s1168_s19 = smov %s916_s20  ;;  %s1169_s20 = smov %s1062_s15 }
 0x167   : > { %s1170_s21 = smov %s1046_s9  ;;  %22 = sbr.rel (!%p20_p5) target bundleno = 7 (0x7), region = 101 }
 0x16c   :  { %483 = vsyncpa [#allocation3], 1 }
 0x16d   :  { %485 = vsyncpa [#allocation3 + $0x1], 1 }
 0x16e   :  { %486 = vsyncpa [#allocation6], 1 }
 0x16f   :  { %487 = vsyncpa [#allocation9], 1 }
 0x170   :  { %488 = vsyncpa [#allocation4], 1 }
 0x171   :  { %490 = vsyncpa [#allocation4 + $0x1], 1 }

</bundles_post_ra>
